<compile_context>
chip_gen: v6e
topology: v6e:2x2x1
jax: 0.10.0
libtpu: 0.0.40
codegen_flags: <defaults>
</compile_context>

<pallas_src>
import functools

import jax
import jax.numpy as jnp
from jax.experimental import pallas as pl
from jax.experimental.pallas import tpu as pltpu


def _round_up(v, m):
    return (v + m - 1) // m * m


def _quant_linear_kernel(x_ref, w_ref, scale_ref, inv_scale_ref, zp_ref, b_ref,
                         o_ref, acc_ref, *, weight_bit, full_precision_flag,
                         compute_dtype):
    k = pl.program_id(2)

    @pl.when(k == 0)
    def _init():
        acc_ref[...] = jnp.zeros_like(acc_ref)

    # (tk, tn) weight tile, already transposed to (in_features, out_features).
    w = w_ref[...].astype(jnp.float32)
    if not full_precision_flag:
        scale = scale_ref[...]          # (1, tn) f32, broadcast over K rows
        inv_scale = inv_scale_ref[...]  # precomputed 1/scale (no per-tile division)
        zp = zp_ref[...]
        half = float(2 ** (weight_bit - 1))
        q = jnp.clip(jnp.round(scale * w - zp), -half, half - 1.0)
        w = (q + zp) * inv_scale

    x = x_ref[...].astype(compute_dtype)               # (tm, tk)
    acc_ref[...] += jnp.dot(x, w.astype(compute_dtype),
                            preferred_element_type=jnp.float32)

    @pl.when(k == pl.num_programs(2) - 1)
    def _finalize():
        o_ref[...] = (acc_ref[...] + b_ref[...]).astype(o_ref.dtype)


def quant_linear(x, weight, bias=None, *, weight_bit=8,
                 full_precision_flag=False, compute_dtype=jnp.bfloat16,
                 tm=256, tn=512, tk=512):
    """y = x @ dequant(weight).T + bias, with asymmetric per-row weight quant."""
    M, K = x.shape
    N, Kw = weight.shape
    assert K == Kw, "in_features mismatch"
    out_dtype = x.dtype

    w32 = weight.astype(jnp.float32)

    # ---- pure-JAX prologue: per-output-row scale / zero_point (full-row reduce) ----
    if full_precision_flag:
        scale = jnp.ones((N,), jnp.float32)
        inv_scale = jnp.ones((N,), jnp.float32)
        zp = jnp.zeros((N,), jnp.float32)
    else:
        w_min = jnp.min(w32, axis=1)
        w_max = jnp.max(w32, axis=1)
        n_levels = float(2 ** weight_bit - 1)
        scale = n_levels / jnp.maximum(w_max - w_min, 1e-8)
        zp = jnp.round(scale * w_min) + float(2 ** (weight_bit - 1))
        inv_scale = 1.0 / scale

    if bias is None:
        bias = jnp.zeros((N,), jnp.float32)
    bias32 = bias.astype(jnp.float32)

    # One-time layout change: (out, in) -> (in, out) so the kernel does (M,K)@(K,N).
    wt = w32.T

    # ---- tile selection (shrink for small problems, keep MXU/lane alignment) ----
    tm = min(tm, _round_up(M, 8))
    tn = min(tn, _round_up(N, 128))
    tk = min(tk, _round_up(K, 128))
    Mp, Np, Kp = _round_up(M, tm), _round_up(N, tn), _round_up(K, tk)

    # Zero padding keeps the matmul exact: padded K columns of x are zero, padded
    # M rows / N columns are sliced off; padded scale=1, zp=0 keeps dequant benign.
    x_p = jnp.pad(x, ((0, Mp - M), (0, Kp - K)))
    wt_p = jnp.pad(wt, ((0, Kp - K), (0, Np - N)))
    scale_p = jnp.pad(scale, (0, Np - N), constant_values=1.0).reshape(1, Np)
    inv_scale_p = jnp.pad(inv_scale, (0, Np - N),
                          constant_values=1.0).reshape(1, Np)
    zp_p = jnp.pad(zp, (0, Np - N)).reshape(1, Np)
    bias_p = jnp.pad(bias32, (0, Np - N)).reshape(1, Np)

    grid = (Mp // tm, Np // tn, Kp // tk)

    kernel = functools.partial(
        _quant_linear_kernel,
        weight_bit=weight_bit,
        full_precision_flag=full_precision_flag,
        compute_dtype=compute_dtype,
    )

    itemsize = jnp.dtype(out_dtype).itemsize
    cost = pl.CostEstimate(
        flops=2 * M * N * K,
        transcendentals=0,
        bytes_accessed=(x_p.size * 4 + wt_p.size * 4 * grid[0] + Mp * Np * itemsize),
    )

    out_p = pl.pallas_call(
        kernel,
        out_shape=jax.ShapeDtypeStruct((Mp, Np), out_dtype),
        grid_spec=pltpu.PrefetchScalarGridSpec(
            num_scalar_prefetch=0,
            grid=grid,
            in_specs=[
                pl.BlockSpec((tm, tk), lambda i, j, k: (i, k)),   # x
                pl.BlockSpec((tk, tn), lambda i, j, k: (k, j)),   # weight.T
                pl.BlockSpec((1, tn), lambda i, j, k: (0, j)),    # scale
                pl.BlockSpec((1, tn), lambda i, j, k: (0, j)),    # 1/scale
                pl.BlockSpec((1, tn), lambda i, j, k: (0, j)),    # zero_point
                pl.BlockSpec((1, tn), lambda i, j, k: (0, j)),    # bias
            ],
            out_specs=pl.BlockSpec((tm, tn), lambda i, j, k: (i, j)),
            scratch_shapes=[pltpu.VMEM((tm, tn), jnp.float32)],
        ),
        compiler_params=pltpu.CompilerParams(
            dimension_semantics=("parallel", "parallel", "arbitrary"),
            vmem_limit_bytes=32 * 1024 * 1024,
        ),
        cost_estimate=cost,
    )(x_p, wt_p, scale_p, inv_scale_p, zp_p, bias_p)

    return out_p[:M, :N]


def quant_linear_ref(x, weight, bias, *, weight_bit=8, full_precision_flag=False):
    """Pure-JAX reference of the PyTorch forward (f32 throughout)."""
    w = weight.astype(jnp.float32)
    if not full_precision_flag:
        w_min = jnp.min(w, axis=1, keepdims=True)
        w_max = jnp.max(w, axis=1, keepdims=True)
        n_levels = float(2 ** weight_bit - 1)
        scale = n_levels / jnp.maximum(w_max - w_min, 1e-8)
        zero_point = jnp.round(scale * w_min) + float(2 ** (weight_bit - 1))
        half = float(2 ** (weight_bit - 1))
        q = jnp.clip(jnp.round(scale * w - zero_point), -half, half - 1.0)
        w = (q + zero_point) / scale
    y = x.astype(jnp.float32) @ w.T
    if bias is not None:
        y = y + bias.astype(jnp.float32)[None, :]
    return y


if __name__ == "__main__":
    key = jax.random.PRNGKey(0)
    weight_bit = 8

    # --- check 1: small nn.Linear-like shapes, default (bf16 MXU) path -----------
    batch, in_features, out_features = 8, 32, 16
    kx, kw, kb = jax.random.split(key, 3)
    x = jax.random.normal(kx, (batch, in_features), dtype=jnp.float32)
    weight = jax.random.normal(kw, (out_features, in_features),
                               dtype=jnp.float32) * 0.1
    bias = jax.random.normal(kb, (out_features,), dtype=jnp.float32) * 0.01

    out = quant_linear(x, weight, bias, weight_bit=weight_bit)
    out = jax.block_until_ready(out)
    ref = quant_linear_ref(x, weight, bias, weight_bit=weight_bit)
    assert out.shape == (batch, out_features)
    assert jnp.allclose(out, ref, atol=3e-2, rtol=3e-2), "bf16 path mismatch"

    # --- check 2: multi-tile grid (M,N,K all tiled), f32 compute, tight tol ------
    b2, k2, n2 = 16, 384, 256
    kx2, kw2, kb2 = jax.random.split(jax.random.PRNGKey(1), 3)
    x2 = jax.random.normal(kx2, (b2, k2), dtype=jnp.float32)
    w2 = jax.random.normal(kw2, (n2, k2), dtype=jnp.float32) * 0.05
    bias2 = jax.random.normal(kb2, (n2,), dtype=jnp.float32) * 0.01

    out2 = quant_linear(x2, w2, bias2, weight_bit=weight_bit,
                        compute_dtype=jnp.float32, tm=8, tn=128, tk=128)
    out2 = jax.block_until_ready(out2)
    ref2 = quant_linear_ref(x2, w2, bias2, weight_bit=weight_bit)
    assert jnp.allclose(out2, ref2, atol=1e-4, rtol=1e-4), "tiled f32 mismatch"

    # --- check 3: full_precision_flag=True path ----------------------------------
    out3 = quant_linear(x, weight, bias, weight_bit=weight_bit,
                        full_precision_flag=True, compute_dtype=jnp.float32)
    out3 = jax.block_until_ready(out3)
    ref3 = quant_linear_ref(x, weight, bias, weight_bit=weight_bit,
                            full_precision_flag=True)
    assert jnp.allclose(out3, ref3, atol=1e-4, rtol=1e-4), "fp32 path mismatch"

    print("KERNEL_OK")
</pallas_src>

<mosaic_0001>
module attributes {stable_mosaic.version = 11 : i64} {
  func.func @_quant_linear_kernel(%arg0: i32, %arg1: i32, %arg2: i32, %arg3: memref<8x128xf32, #tpu.memory_space<vmem>>, %arg4: memref<128x128xf32, #tpu.memory_space<vmem>>, %arg5: memref<1x128xf32, #tpu.memory_space<vmem>>, %arg6: memref<1x128xf32, #tpu.memory_space<vmem>>, %arg7: memref<1x128xf32, #tpu.memory_space<vmem>>, %arg8: memref<1x128xf32, #tpu.memory_space<vmem>>, %arg9: memref<8x128xf32, #tpu.memory_space<vmem>>, %arg10: memref<8x128xf32, #tpu.memory_space<vmem>>) attributes {dimension_semantics = [#tpu.dimension_semantics<parallel>, #tpu.dimension_semantics<parallel>, #tpu.dimension_semantics<arbitrary>], iteration_bounds = array<i64: 1, 1, 1>, scalar_prefetch = 0 : i64, scratch_operands = 1 : i64, tpu.core_type = #tpu.core_type<tc>, window_params = [{transform_indices = @transform_0, window_bounds = array<i64: 8, 128>}, {transform_indices = @transform_1, window_bounds = array<i64: 128, 128>}, {transform_indices = @transform_2, window_bounds = array<i64: 1, 128>}, {transform_indices = @transform_3, window_bounds = array<i64: 1, 128>}, {transform_indices = @transform_4, window_bounds = array<i64: 1, 128>}, {transform_indices = @transform_5, window_bounds = array<i64: 1, 128>}, {transform_indices = @transform_6, window_bounds = array<i64: 8, 128>}]} {
    %c0_i32 = arith.constant 0 : i32
    %0 = arith.cmpi eq, %arg2, %c0_i32 : i32
    %1 = arith.extui %0 : i1 to i32
    %c0_i32_0 = arith.constant 0 : i32
    %2 = arith.cmpi ne, %1, %c0_i32_0 : i32
    scf.if %2 {
      %cst_18 = arith.constant 0.000000e+00 : f32
      %30 = vector.broadcast %cst_18 : f32 to vector<8x128xf32>
      %c0_19 = arith.constant 0 : index
      %c0_20 = arith.constant 0 : index
      %31 = vector.load %arg10[%c0_19, %c0_20] : memref<8x128xf32, #tpu.memory_space<vmem>>, vector<8x128xf32>
      tpu.vector_store %arg10[%c0_19, %c0_20], %30 {strides = array<i32>} : memref<8x128xf32, #tpu.memory_space<vmem>>, vector<8x128xf32>,
    } else {
    }
    %c0 = arith.constant 0 : index
    %c0_1 = arith.constant 0 : index
    %3 = vector.load %arg4[%c0, %c0_1] : memref<128x128xf32, #tpu.memory_space<vmem>>, vector<128x128xf32>
    %c0_2 = arith.constant 0 : index
    %c0_3 = arith.constant 0 : index
    %4 = vector.load %arg5[%c0_2, %c0_3] : memref<1x128xf32, #tpu.memory_space<vmem>>, vector<1x128xf32>
    %c0_4 = arith.constant 0 : index
    %c0_5 = arith.constant 0 : index
    %5 = vector.load %arg6[%c0_4, %c0_5] : memref<1x128xf32, #tpu.memory_space<vmem>>, vector<1x128xf32>
    %c0_6 = arith.constant 0 : index
    %c0_7 = arith.constant 0 : index
    %6 = vector.load %arg7[%c0_6, %c0_7] : memref<1x128xf32, #tpu.memory_space<vmem>>, vector<1x128xf32>
    %7 = vector.broadcast %4 : vector<1x128xf32> to vector<128x128xf32>
    %8 = arith.mulf %7, %3 : vector<128x128xf32>
    %9 = vector.broadcast %6 : vector<1x128xf32> to vector<128x128xf32>
    %10 = arith.subf %8, %9 : vector<128x128xf32>
    %11 = math.roundeven %10 : vector<128x128xf32>
    %cst = arith.constant -1.280000e+02 : f32
    %cst_8 = arith.constant 1.270000e+02 : f32
    %12 = vector.broadcast %cst : f32 to vector<128x128xf32>
    %13 = arith.maximumf %12, %11 : vector<128x128xf32>
    %14 = vector.broadcast %cst_8 : f32 to vector<128x128xf32>
    %15 = arith.minimumf %14, %13 : vector<128x128xf32>
    %16 = vector.broadcast %6 : vector<1x128xf32> to vector<128x128xf32>
    %17 = arith.addf %15, %16 : vector<128x128xf32>
    %18 = vector.broadcast %5 : vector<1x128xf32> to vector<128x128xf32>
    %19 = arith.mulf %17, %18 : vector<128x128xf32>
    %c0_9 = arith.constant 0 : index
    %c0_10 = arith.constant 0 : index
    %20 = vector.load %arg3[%c0_9, %c0_10] : memref<8x128xf32, #tpu.memory_space<vmem>>, vector<8x128xf32>
    %21 = arith.truncf %20 : vector<8x128xf32> to vector<8x128xbf16>
    %c0_11 = arith.constant 0 : index
    %c0_12 = arith.constant 0 : index
    %22 = vector.load %arg10[%c0_11, %c0_12] : memref<8x128xf32, #tpu.memory_space<vmem>>, vector<8x128xf32>
    %23 = arith.truncf %19 : vector<128x128xf32> to vector<128x128xbf16>
    %cst_13 = arith.constant dense<0.000000e+00> : vector<8x128xf32>
    %24 = tpu.matmul %21, %23, %cst_13 {dimension_numbers = #tpu.dot_dimension_numbers<[1], [0], [0], [1], [0, 0, 1, 1], [], []>} : vector<8x128xbf16>, vector<128x128xbf16>, vector<8x128xf32> -> vector<8x128xf32>
    %25 = arith.addf %22, %24 : vector<8x128xf32>
    %c0_14 = arith.constant 0 : index
    %c0_15 = arith.constant 0 : index
    %26 = vector.load %arg10[%c0_14, %c0_15] : memref<8x128xf32, #tpu.memory_space<vmem>>, vector<8x128xf32>
    tpu.vector_store %arg10[%c0_14, %c0_15], %25 {strides = array<i32>} : memref<8x128xf32, #tpu.memory_space<vmem>>, vector<8x128xf32>,
    %c0_i32_16 = arith.constant 0 : i32
    %27 = arith.cmpi eq, %arg2, %c0_i32_16 : i32
    %28 = arith.extui %27 : i1 to i32
    %c0_i32_17 = arith.constant 0 : i32
    %29 = arith.cmpi ne, %28, %c0_i32_17 : i32
    scf.if %29 {
      %c0_18 = arith.constant 0 : index
      %c0_19 = arith.constant 0 : index
      %30 = vector.load %arg10[%c0_18, %c0_19] : memref<8x128xf32, #tpu.memory_space<vmem>>, vector<8x128xf32>
      %c0_20 = arith.constant 0 : index
      %c0_21 = arith.constant 0 : index
      %31 = vector.load %arg8[%c0_20, %c0_21] : memref<1x128xf32, #tpu.memory_space<vmem>>, vector<1x128xf32>
      %32 = vector.broadcast %31 : vector<1x128xf32> to vector<8x128xf32>
      %33 = arith.addf %30, %32 : vector<8x128xf32>
      %c0_22 = arith.constant 0 : index
      %c0_23 = arith.constant 0 : index
      %34 = vector.load %arg9[%c0_22, %c0_23] : memref<8x128xf32, #tpu.memory_space<vmem>>, vector<8x128xf32>
      tpu.vector_store %arg9[%c0_22, %c0_23], %33 {strides = array<i32>} : memref<8x128xf32, #tpu.memory_space<vmem>>, vector<8x128xf32>,
    } else {
    }
    return
  }
  func.func @transform_0(%arg0: i32, %arg1: i32, %arg2: i32) -> (i32, i32) {
    %c0_i32 = arith.constant 0 : i32
    return %arg0, %arg2 : i32, i32
  }
  func.func @transform_1(%arg0: i32, %arg1: i32, %arg2: i32) -> (i32, i32) {
    %c0_i32 = arith.constant 0 : i32
    return %arg2, %arg1 : i32, i32
  }
  func.func @transform_2(%arg0: i32, %arg1: i32, %arg2: i32) -> (i32, i32) {
    %c0_i32 = arith.constant 0 : i32
    %c0_i32_0 = arith.constant 0 : i32
    return %c0_i32, %arg1 : i32, i32
  }
  func.func @transform_3(%arg0: i32, %arg1: i32, %arg2: i32) -> (i32, i32) {
    %c0_i32 = arith.constant 0 : i32
    %c0_i32_0 = arith.constant 0 : i32
    return %c0_i32, %arg1 : i32, i32
  }
  func.func @transform_4(%arg0: i32, %arg1: i32, %arg2: i32) -> (i32, i32) {
    %c0_i32 = arith.constant 0 : i32
    %c0_i32_0 = arith.constant 0 : i32
    return %c0_i32, %arg1 : i32, i32
  }
  func.func @transform_5(%arg0: i32, %arg1: i32, %arg2: i32) -> (i32, i32) {
    %c0_i32 = arith.constant 0 : i32
    %c0_i32_0 = arith.constant 0 : i32
    return %c0_i32, %arg1 : i32, i32
  }
  func.func @transform_6(%arg0: i32, %arg1: i32, %arg2: i32) -> (i32, i32) {
    %c0_i32 = arith.constant 0 : i32
    return %arg0, %arg1 : i32, i32
  }
}

</mosaic_0001>

<bundles_post_ra>
// kernel: tpu_custom_call.1
= control target key start
LH: loop header
LB: loop body
LE: loop exit
PB: predicated region body
PF: predicated region fallthrough
CT: control target
= control target key end

     0   :  { %11 = vsyncpa [#allocation4], 0  ;;  %s759_s0 = inlined_call_operand.hbm [shape: f32[8,128], index: 0, kind: input, shape index: {}]   ;;  %s760_s1 = inlined_call_operand.hbm [shape: f32[128,128], index: 1, kind: input, shape index: {}]   ;;  %s761_s2 = inlined_call_operand.vmem [shape: f32[1,128], index: 2, kind: input, shape index: {}]   ;;  %s762_s3 = inlined_call_operand.vmem [shape: f32[1,128], index: 3, kind: input, shape index: {}]   ;;  %s763_s4 = inlined_call_operand.vmem [shape: f32[1,128], index: 4, kind: input, shape index: {}]   ;;  %s764_s5 = inlined_call_operand.vmem [shape: f32[1,128], index: 5, kind: input, shape index: {}]   ;;  %s765_s6 = inlined_call_operand.hbm [shape: f32[8,128], index: 6, kind: output, shape index: {}]  }
   0x1   :  { %12 = vsyncpa [#allocation7], 0 }
   0x2   :  { %13 = vsyncpa [#allocation5], 0  ;;  %s521_s21 = smov [#allocation3]   ;;  %s522_s23 = smov [#allocation6]  }
   0x3   :  { %s20_s22 = sshll.u32 %s521_s21, 4  ;;  %s29_s24 = sshll.u32 %s522_s23, 4  ;;  %s21_s22 = int_to_ptr.vmem [resolvable:$true] %s20_s22  ;;  %s30_s24 = int_to_ptr.vmem [resolvable:$true] %s29_s24 }
   0x4   :  { %s463_s25 = scalar_lea.vmem %s21_s22, 128  ;;  %p468_p1 = scmp.lt.s32.totalorder %s21_s22, %s21_s22 }
   0x5   :  { %p464_p0 = scmp.ne.s32.totalorder %s21_s22, %s463_s25  ;;  %p469_p2 = scmp.lt.s32.totalorder %s463_s25, %s463_s25 }
   0x7   :  { %p470_p3 = por %p469_p2, %p468_p1 }
   0x9   :  { %p471_p4 = pnand %p470_p3, %p464_p0 }
   0xb   :  { %474 = shalt.err (!%p471_p4)
}
   0xc   :  { %23 = dma.hbm_to_vmem [thread:$0]  %s759_s0, 128, %s21_s22, [#allocation4]  }
   0xd   :  { %s483_s28 = scalar_lea.vmem %s30_s24, 2048  ;;  %p488_p6 = scmp.lt.s32.totalorder %s30_s24, %s30_s24 }
   0xe   :  { %p484_p5 = scmp.ne.s32.totalorder %s30_s24, %s483_s28  ;;  %p489_p7 = scmp.lt.s32.totalorder %s483_s28, %s483_s28 }
  0x10   :  { %p490_p8 = por %p489_p7, %p488_p6 }
  0x12   :  { %p491_p9 = pnand %p490_p8, %p484_p5 }
  0x14   :  { %494 = shalt.err (!%p491_p9)
}
  0x15   :  { %s523_s29 = smov 128   ;;  %s524_s30 = smov 8  }
  0x16   :  { %35 = dma.hbm_to_vmem [thread:$0]  %s760_s1, 2048, %s30_s24, [#allocation7], %s523_s29, %s523_s29, %s524_s30  }
  0x17   :  { %515 = dma.done.wait [#allocation4], 128  }
  0x18   :  { %516 = vsyncadd [#allocation4], 4294967168 }
  0x19   :  { %517 = dma.done.wait [#allocation7], 2048  }
  0x1a   :  { %518 = vsyncadd [#allocation7], 4294965248  ;;  %v525_v0 = vmov 0.0   ;;  %vm526_vm0 = vmmov 0   ;;  %v70_v1 = vld [vmem:[#allocation6 + $0x70] sm:$0xff]  ;;  %v71_v2 = vld [vmem:[#allocation6 + $0x78] sm:$0xff] }
  0x1b   :  { %300 = vmatprep.subr.bf16.mxu0 %v525_v0  ;;  %316 = vmatprep.mubr.msk.bf16.mxu0 %vm526_vm0, %v525_v0  ;;  %v574_v3 = vld [vmem:[%s761_s2] ss:$0 sm:$0xff]  ;;  %v68_v7 = vld [vmem:[#allocation6 + $0x60] sm:$0xff]  ;;  %v69_v8 = vld [vmem:[#allocation6 + $0x68] sm:$0xff]  ;;  %s527_s12 = smov [#allocation8]  }
  0x1c   :  { %v579_v4 = vld [vmem:[%s763_s4] ss:$0 sm:$0xff]  ;;  %v95_v5 = vmul.f32 %v574_v3, %v70_v1  ;;  %v96_v6 = vmul.f32 %v574_v3, %v71_v2  ;;  %v93_v9 = vmul.f32 %v574_v3, %v68_v7  ;;  %v66_v10 = vld [vmem:[#allocation6 + $0x50] sm:$0xff]  ;;  %v94_v14 = vmul.f32 %v574_v3, %v69_v8  ;;  %v64_v15 = vld [vmem:[#allocation6 + $0x40] sm:$0xff]  ;;  %s277_s13 = sshll.u32 %s527_s12, 4  ;;  %s278_s13 = int_to_ptr.vmem [resolvable:$true] %s277_s13 }
  0x1d   :  { %v67_v11 = vld [vmem:[#allocation6 + $0x58] sm:$0xff]  ;;  %v65_v16 = vld [vmem:[#allocation6 + $0x48] sm:$0xff]  ;;  %v91_v18 = vmul.f32 %v574_v3, %v66_v10  ;;  %v89_v20 = vmul.f32 %v574_v3, %v64_v15  ;;  %v62_v33 = vld [vmem:[#allocation6 + $0x30] sm:$0xff]  ;;  %s495_s14 = scalar_lea.vmem %s278_s13, 128  ;;  %p500_p11 = scmp.lt.s32.totalorder %s278_s13, %s278_s13 }
  0x1e   :  { %v117_v12 = vsub.f32 %v95_v5, %v579_v4  ;;  %v118_v13 = vsub.f32 %v96_v6, %v579_v4  ;;  %v115_v17 = vsub.f32 %v93_v9, %v579_v4  ;;  %v92_v19 = vmul.f32 %v574_v3, %v67_v11  ;;  %v631_v8 = vld [vmem:[%s762_s3] ss:$0 sm:$0xff]  ;;  %p496_p10 = scmp.ne.s32.totalorder %s278_s13, %s495_s14  ;;  %p501_p12 = scmp.lt.s32.totalorder %s495_s14, %s495_s14 }
  0x1f   :  { %v90_v24 = vmul.f32 %v574_v3, %v65_v16  ;;  %v116_v27 = vsub.f32 %v94_v14, %v579_v4  ;;  %v113_v44 = vsub.f32 %v91_v18, %v579_v4  ;;  %v614_v52 = vsub.f32 %v89_v20, %v579_v4  ;;  %v63_v42 = vld [vmem:[#allocation6 + $0x38] sm:$0xff] }
  0x20   :  { %v432_v21 = vand.u32 2147483647, %v117_v12  ;;  %v434_v22 = vcvt.f32.s32 %v117_v12  ;;  %v440_v23 = vand.u32 2147483647, %v118_v13  ;;  %v437_v25 = vand.u32 2147483648, %v117_v12  ;;  %p502_p13 = por %p501_p12, %p500_p11 }
  0x21   :  { %v442_v26 = vcvt.f32.s32 %v118_v13  ;;  %v416_v28 = vand.u32 2147483647, %v115_v17  ;;  %v445_v31 = vand.u32 2147483648, %v118_v13  ;;  %v418_v32 = vcvt.f32.s32 %v115_v17 }
  0x22   :  { %vm593_vm1 = vcmp.lt.f32.partialorder %v432_v21, 8388608.0  ;;  %v435_v30 = vcvt.s32.f32 %v434_v22  ;;  %vm597_vm2 = vcmp.lt.f32.partialorder %v440_v23, 8388608.0  ;;  %v424_v36 = vand.u32 2147483647, %v116_v27  ;;  %p503_p0 = pnand %p502_p13, %p496_p10 }
  0x23   :  { %v443_v34 = vcvt.s32.f32 %v442_v26  ;;  %vm601_vm3 = vcmp.lt.f32.partialorder %v416_v28, 8388608.0  ;;  %v419_v38 = vcvt.s32.f32 %v418_v32  ;;  %v421_v39 = vand.u32 2147483648, %v115_v17 }
  0x24   :  { %v436_v37 = vand.u32 2147483647, %v435_v30  ;;  %v426_v40 = vcvt.f32.s32 %v116_v27  ;;  %vm605_vm4 = vcmp.lt.f32.partialorder %v424_v36, 8388608.0  ;;  %v429_v43 = vand.u32 2147483648, %v116_v27 }
  0x25   :  { %v444_v41 = vand.u32 2147483647, %v443_v34  ;;  %v420_v46 = vand.u32 2147483647, %v419_v38  ;;  %v611_v48 = vsub.f32 %v92_v19, %v579_v4  ;;  %v400_v50 = vand.u32 2147483647, %v113_v44 }
  0x26   :  { %v438_v45 = vor.u32 %v437_v25, %v436_v37  ;;  %v427_v47 = vcvt.s32.f32 %v426_v40  ;;  %v402_v51 = vcvt.f32.s32 %v113_v44  ;;  %v405_v56 = vand.u32 2147483648, %v113_v44 }
  0x27   :  { %v446_v49 = vor.u32 %v445_v31, %v444_v41  ;;  %v422_v54 = vor.u32 %v421_v39, %v420_v46  ;;  %v408_v60 = vand.u32 2147483647, %v611_v48  ;;  %vm623_vm5 = vcmp.lt.f32.partialorder %v400_v50, 8388608.0  ;;  %v56_v39 = vld [vmem:[#allocation6] sm:$0xff] }
  0x28   :  { %v439_v53 = vsel %vm593_vm1, %v438_v45, %v117_v12  ;;  %v428_v55 = vand.u32 2147483647, %v427_v47  ;;  %v403_v59 = vcvt.s32.f32 %v402_v51  ;;  %v410_v7 = vcvt.f32.s32 %v611_v48 }
  0x29   :  { %v447_v57 = vsel %vm597_vm2, %v446_v49, %v118_v13  ;;  %v149_v58 = vmax.f32 %v439_v53, -128.0  ;;  %v423_v62 = vsel %vm601_vm3, %v422_v54, %v115_v17  ;;  %v413_v11 = vand.u32 2147483648, %v611_v48 }
  0x2a   :  { %v150_v61 = vmax.f32 %v447_v57, -128.0  ;;  %v430_v63 = vor.u32 %v429_v43, %v428_v55  ;;  %v147_v5 = vmax.f32 %v423_v62, -128.0  ;;  %v404_v6 = vand.u32 2147483647, %v403_v59  ;;  %v60_v43 = vld [vmem:[#allocation6 + $0x20] sm:$0xff] }
  0x2b   :  { %v165_v2 = vmin.f32 %v149_v58, 127.0  ;;  %v637_v12 = vsub.f32 %v90_v24, %v579_v4  ;;  %v411_v18 = vcvt.s32.f32 %v410_v7  ;;  %v384_v19 = vand.u32 2147483647, %v614_v52 }
  0x2c   :  { %v166_v9 = vmin.f32 %v150_v61, 127.0  ;;  %v431_v10 = vsel %vm605_vm4, %v430_v63, %v116_v27  ;;  %v163_v15 = vmin.f32 %v147_v5, 127.0  ;;  %v406_v16 = vor.u32 %v405_v56, %v404_v6  ;;  %v61_v56 = vld [vmem:[#allocation6 + $0x28] sm:$0xff] }
  0x2d   :  { %v181_v13 = vadd.f32 %v579_v4, %v165_v2  ;;  %v148_v14 = vmax.f32 %v431_v10, -128.0  ;;  %v386_v20 = vcvt.f32.s32 %v614_v52  ;;  %vm648_vm6 = vcmp.lt.f32.partialorder %v408_v60, 8388608.0 }
  0x2e   :  { %v182_v17 = vadd.f32 %v579_v4, %v166_v9  ;;  %v179_v23 = vadd.f32 %v579_v4, %v163_v15  ;;  %v407_v24 = vsel %vm623_vm5, %v406_v16, %v113_v44  ;;  %v412_v27 = vand.u32 2147483647, %v411_v18 }
  0x2f   :  { %v203_v21 = vmul.f32 %v631_v8, %v181_v13  ;;  %v164_v22 = vmin.f32 %v148_v14, 127.0  ;;  %v145_v28 = vmax.f32 %v407_v24, -128.0  ;;  %v387_v31 = vcvt.s32.f32 %v386_v20 }
  0x30   :  { %v204_v25 = vmul.f32 %v631_v8, %v182_v17  ;;  %v201_v30 = vmul.f32 %v631_v8, %v179_v23  ;;  %v389_v32 = vand.u32 2147483648, %v614_v52  ;;  %v414_v35 = vor.u32 %v413_v11, %v412_v27 }
  0x31   :  { %v180_v29 = vadd.f32 %v579_v4, %v164_v22  ;;  %v161_v36 = vmin.f32 %v145_v28, 127.0  ;;  %v392_v37 = vand.u32 2147483647, %v637_v12  ;;  %vm657_vm7 = vcmp.lt.f32.partialorder %v384_v19, 8388608.0 }
  0x32   :  { %v215_v34 = vpack.c.bf16 %v204_v25, %v203_v21  ;;  %v388_v40 = vand.u32 2147483647, %v387_v31  ;;  %v394_v41 = vcvt.f32.s32 %v637_v12  ;;  %v415_v44 = vsel %vm648_vm6, %v414_v35, %v611_v48 }
  0x33   :  { %v202_v38 = vmul.f32 %v631_v8, %v180_v29  ;;  %v177_v45 = vadd.f32 %v579_v4, %v161_v36  ;;  %v397_v46 = vand.u32 2147483648, %v637_v12  ;;  %v87_v47 = vmul.f32 %v574_v3, %v62_v33  ;;  %v58_v33 = vld [vmem:[#allocation6 + $0x10] sm:$0xff] }
  0x34   :  { %301 = vmatpush3.bf16.msra.mxu0 %v215_v34  ;;  %v146_v50 = vmax.f32 %v415_v44, -128.0  ;;  %v390_v51 = vor.u32 %v389_v32, %v388_v40  ;;  %v395_v53 = vcvt.s32.f32 %v394_v41  ;;  %vm669_vm8 = vcmp.lt.f32.partialorder %v392_v37, 8388608.0 }
  0x35   :  { %302 = vmatprep.subr.bf16.mxu0 %v525_v0  ;;  %v214_v49 = vpack.c.bf16 %v202_v38, %v201_v30  ;;  %v88_v55 = vmul.f32 %v574_v3, %v63_v42  ;;  %v109_v48 = vsub.f32 %v87_v47, %v579_v4  ;;  %v85_v57 = vmul.f32 %v574_v3, %v60_v43  ;;  %v59_v38 = vld [vmem:[#allocation6 + $0x18] sm:$0xff] }
  0x36   :  { %v162_v58 = vmin.f32 %v146_v50, 127.0  ;;  %v199_v59 = vmul.f32 %v631_v8, %v177_v45  ;;  %v391_v60 = vsel %vm657_vm7, %v390_v51, %v614_v52  ;;  %v396_v61 = vand.u32 2147483647, %v395_v53 }
  0x37   :  { %v143_v62 = vmax.f32 %v391_v60, -128.0  ;;  %v110_v63 = vsub.f32 %v88_v55, %v579_v4  ;;  %v368_v1 = vand.u32 2147483647, %v109_v48  ;;  %v370_v2 = vcvt.f32.s32 %v109_v48 }
  0x38   :  { %303 = vmatpush3.bf16.msra.mxu0 %v214_v49  ;;  %v178_v5 = vadd.f32 %v579_v4, %v162_v58  ;;  %v398_v6 = vor.u32 %v397_v46, %v396_v61  ;;  %v373_v7 = vand.u32 2147483648, %v109_v48  ;;  %v86_v9 = vmul.f32 %v574_v3, %v61_v56 }
  0x39   :  { %304 = vmatprep.subr.bf16.mxu0 %v525_v0  ;;  %v159_v10 = vmin.f32 %v143_v62, 127.0  ;;  %v371_v11 = vcvt.s32.f32 %v370_v2  ;;  %v376_v13 = vand.u32 2147483647, %v110_v63  ;;  %v107_v52 = vsub.f32 %v85_v57, %v579_v4  ;;  %v57_v57 = vld [vmem:[#allocation6 + $0x8] sm:$0xff] }
  0x3a   :  { %v200_v14 = vmul.f32 %v631_v8, %v178_v5  ;;  %v399_v15 = vsel %vm669_vm8, %v398_v6, %v637_v12  ;;  %vm689_vm9 = vcmp.lt.f32.partialorder %v368_v1, 8388608.0  ;;  %v378_v17 = vcvt.f32.s32 %v110_v63 }
  0x3b   :  { %v144_v18 = vmax.f32 %v399_v15, -128.0  ;;  %v175_v19 = vadd.f32 %v579_v4, %v159_v10  ;;  %v372_v20 = vand.u32 2147483647, %v371_v11  ;;  %v381_v21 = vand.u32 2147483648, %v110_v63 }
  0x3c   :  { %v213_v22 = vpack.c.bf16 %v200_v14, %v199_v59  ;;  %v379_v23 = vcvt.s32.f32 %v378_v17  ;;  %v108_v24 = vsub.f32 %v86_v9, %v579_v4  ;;  %v352_v25 = vand.u32 2147483647, %v107_v52 }
  0x3d   :  { %v160_v26 = vmin.f32 %v144_v18, 127.0  ;;  %v374_v27 = vor.u32 %v373_v7, %v372_v20  ;;  %vm695_vm10 = vcmp.lt.f32.partialorder %v376_v13, 8388608.0  ;;  %v354_v12 = vcvt.f32.s32 %v107_v52 }
  0x3e   :  { %305 = vmatpush3.bf16.msra.mxu0 %v213_v22  ;;  %v197_v29 = vmul.f32 %v631_v8, %v175_v19  ;;  %v380_v30 = vand.u32 2147483647, %v379_v23  ;;  %vm700_vm11 = vcmp.lt.f32.partialorder %v352_v25, 8388608.0  ;;  %v357_v32 = vand.u32 2147483648, %v107_v52 }
  0x3f   :  { %306 = vmatprep.subr.bf16.mxu0 %v525_v0  ;;  %v176_v34 = vadd.f32 %v579_v4, %v160_v26  ;;  %v375_v35 = vsel %vm689_vm9, %v374_v27, %v109_v48  ;;  %v355_v36 = vcvt.s32.f32 %v354_v12  ;;  %v362_v37 = vcvt.f32.s32 %v108_v24 }
  0x40   :  { %v382_v40 = vor.u32 %v381_v21, %v380_v30  ;;  %v141_v41 = vmax.f32 %v375_v35, -128.0  ;;  %v360_v42 = vand.u32 2147483647, %v108_v24  ;;  %v365_v43 = vand.u32 2147483648, %v108_v24 }
  0x41   :  { %v198_v44 = vmul.f32 %v631_v8, %v176_v34  ;;  %v356_v45 = vand.u32 2147483647, %v355_v36  ;;  %v363_v46 = vcvt.s32.f32 %v362_v37  ;;  %v83_v47 = vmul.f32 %v574_v3, %v58_v33 }
  0x42   :  { %v383_v49 = vsel %vm695_vm10, %v382_v40, %v110_v63  ;;  %v157_v50 = vmin.f32 %v141_v41, 127.0  ;;  %v84_v51 = vmul.f32 %v574_v3, %v59_v38  ;;  %v81_v53 = vmul.f32 %v574_v3, %v56_v39 }
  0x43   :  { %v212_v54 = vpack.c.bf16 %v198_v44, %v197_v29  ;;  %v142_v55 = vmax.f32 %v383_v49, -128.0  ;;  %v358_v48 = vor.u32 %v357_v32, %v356_v45  ;;  %v364_v56 = vand.u32 2147483647, %v363_v46 }
  0x44   :  { %v173_v58 = vadd.f32 %v579_v4, %v157_v50  ;;  %vm715_vm12 = vcmp.lt.f32.partialorder %v360_v42, 8388608.0  ;;  %v105_v60 = vsub.f32 %v83_v47, %v579_v4  ;;  %v106_v1 = vsub.f32 %v84_v51, %v579_v4 }
  0x45   :  { %307 = vmatpush3.bf16.msra.mxu0 %v212_v54  ;;  %v158_v61 = vmin.f32 %v142_v55, 127.0  ;;  %v359_v62 = vsel %vm700_vm11, %v358_v48, %v107_v52  ;;  %v366_v63 = vor.u32 %v365_v43, %v364_v56  ;;  %v82_v7 = vmul.f32 %v574_v3, %v57_v57 }
  0x46   :  { %308 = vmatprep.subr.bf16.mxu0 %v525_v0  ;;  %v139_v2 = vmax.f32 %v359_v62, -128.0  ;;  %v336_v5 = vand.u32 2147483647, %v105_v60  ;;  %v338_v6 = vcvt.f32.s32 %v105_v60  ;;  %v195_v10 = vmul.f32 %v631_v8, %v173_v58 }
  0x47   :  { %v174_v9 = vadd.f32 %v579_v4, %v158_v61  ;;  %v367_v11 = vsel %vm715_vm12, %v366_v63, %v108_v24  ;;  %v103_v13 = vsub.f32 %v81_v53, %v579_v4  ;;  %v341_v16 = vand.u32 2147483648, %v105_v60 }
  0x48   :  { %v140_v52 = vmax.f32 %v367_v11, -128.0  ;;  %v155_v14 = vmin.f32 %v139_v2, 127.0  ;;  %v339_v15 = vcvt.s32.f32 %v338_v6  ;;  %vm731_vm13 = vcmp.lt.f32.partialorder %v336_v5, 8388608.0  ;;  %v205_v6 = vld [vmem:[#allocation3] sm:$0xff] }
  0x49   :  { %v196_v17 = vmul.f32 %v631_v8, %v174_v9  ;;  %v344_v3 = vand.u32 2147483647, %v106_v1  ;;  %v346_v19 = vcvt.f32.s32 %v106_v1  ;;  %v104_v23 = vsub.f32 %v82_v7, %v579_v4 }
  0x4a   :  { %v156_v20 = vmin.f32 %v140_v52, 127.0  ;;  %v171_v21 = vadd.f32 %v579_v4, %v155_v14  ;;  %v340_v22 = vand.u32 2147483647, %v339_v15  ;;  %v349_v26 = vand.u32 2147483648, %v106_v1 }
  0x4b   :  { %v211_v24 = vpack.c.bf16 %v196_v17, %v195_v10  ;;  %v347_v25 = vcvt.s32.f32 %v346_v19  ;;  %v322_v27 = vcvt.f32.s32 %v103_v13  ;;  %v320_v30 = vand.u32 2147483647, %v103_v13  ;;  %v290_v10 = vld [vmem:[%s764_s5] ss:$0 sm:$0xff] }
  0x4c   :  { %v172_v28 = vadd.f32 %v579_v4, %v156_v20  ;;  %v193_v12 = vmul.f32 %v631_v8, %v171_v21  ;;  %v342_v29 = vor.u32 %v341_v16, %v340_v22  ;;  %v325_v33 = vand.u32 2147483648, %v103_v13 }
  0x4d   :  { %309 = vmatpush3.bf16.msra.mxu0 %v211_v24  ;;  %v348_v31 = vand.u32 2147483647, %v347_v25  ;;  %v323_v32 = vcvt.s32.f32 %v322_v27  ;;  %vm345_vm14 = vcmp.lt.f32.partialorder %v344_v3, 8388608.0  ;;  %v330_v36 = vcvt.f32.s32 %v104_v23 }
  0x4e   :  { %310 = vmatprep.subr.bf16.mxu0 %v525_v0  ;;  %v194_v34 = vmul.f32 %v631_v8, %v172_v28  ;;  %v343_v35 = vsel %vm731_vm13, %v342_v29, %v105_v60  ;;  %v328_v40 = vand.u32 2147483647, %v104_v23  ;;  %vm321_vm15 = vcmp.lt.f32.partialorder %v320_v30, 8388608.0 }
  0x4f   :  { %v350_v37 = vor.u32 %v349_v26, %v348_v31  ;;  %v137_v38 = vmax.f32 %v343_v35, -128.0  ;;  %v324_v39 = vand.u32 2147483647, %v323_v32  ;;  %v331_v42 = vcvt.s32.f32 %v330_v36 }
  0x50   :  { %v210_v41 = vpack.c.bf16 %v194_v34, %v193_v12  ;;  %v333_v43 = vand.u32 2147483648, %v104_v23  ;;  %vm329_vm0 = vcmp.lt.f32.partialorder %v328_v40, 8388608.0  ;;  %v206_v9 = vpack.c.bf16 %v205_v6, %v205_v6 }
  0x51   :  { %v351_v44 = vsel %vm345_vm14, %v350_v37, %v106_v1  ;;  %v153_v45 = vmin.f32 %v137_v38, 127.0  ;;  %v326_v46 = vor.u32 %v325_v33, %v324_v39  ;;  %v332_v49 = vand.u32 2147483647, %v331_v42 }
  0x52   :  { %311 = vmatpush3.bf16.msra.mxu0 %v210_v41  ;;  %v138_v47 = vmax.f32 %v351_v44, -128.0 }
  0x53   :  { %312 = vmatprep.subr.bf16.mxu0 %v525_v0  ;;  %v169_v50 = vadd.f32 %v579_v4, %v153_v45  ;;  %v327_v51 = vsel %vm321_vm15, %v326_v46, %v103_v13  ;;  %v334_v54 = vor.u32 %v333_v43, %v332_v49 }
  0x54   :  { %v154_v53 = vmin.f32 %v138_v47, 127.0  ;;  %v135_v55 = vmax.f32 %v327_v51, -128.0 }
  0x55   :  { %v191_v56 = vmul.f32 %v631_v8, %v169_v50  ;;  %v335_v57 = vsel %vm329_vm0, %v334_v54, %v104_v23 }
  0x56   :  { %v170_v48 = vadd.f32 %v579_v4, %v154_v53  ;;  %v151_v58 = vmin.f32 %v135_v55, 127.0  ;;  %v136_v59 = vmax.f32 %v335_v57, -128.0 }
  0x58   :  { %v192_v60 = vmul.f32 %v631_v8, %v170_v48  ;;  %v167_v61 = vadd.f32 %v579_v4, %v151_v58  ;;  %v152_v62 = vmin.f32 %v136_v59, 127.0 }
  0x5a   :  { %v209_v63 = vpack.c.bf16 %v192_v60, %v191_v56  ;;  %v168_v1 = vadd.f32 %v579_v4, %v152_v62  ;;  %v189_v2 = vmul.f32 %v631_v8, %v167_v61 }
  0x5c   :  { %313 = vmatpush3.bf16.msra.mxu0 %v209_v63  ;;  %v190_v5 = vmul.f32 %v631_v8, %v168_v1 }
  0x5d   :  { %314 = vmatprep.subr.bf16.mxu0 %v525_v0 }
  0x5e   :  { %v208_v7 = vpack.c.bf16 %v190_v5, %v189_v2 }
  0x60   :  { %315 = vmatpush3.bf16.msra.mxu0 %v208_v7 }
  0x63   :  { %317 = vmatmul.mubr.bf16.vlgmr.msra.gmra.mxu0 %v206_v9 }
 0x123   :  { %v250_v11 = vpop.f32.mrf.mxu0 }
 0x124   :  { %v269_v4 = vadd.f32 %v290_v10, %v250_v11 }
 0x125   :  { %v318_v13 = vpop.f32.mrf.mxu0 }
 0x126   :  { %270 = vst [vmem:[#allocation8] sm:$0xff] %v269_v4 }
 0x127   :  { %v253_v52 = vpop.f32.mrf.mxu0 }
 0x128   :  { %506 = shalt.err (!%p503_p0)
}
 0x129   :  { %280 = dma.vmem_to_hbm [thread:$0]  %s278_s13, 128, %s765_s6, [#allocation5]   ;;  %v319_v0 = vpop.f32.mrf.mxu0 }
 0x12a   :  { %519 = dma.done.wait [#allocation5], 128  }
 0x12b   :  { %520 = vsyncadd [#allocation5], 4294967168 }
 0x12c   :  { %284 = vsyncpa [#allocation4], 1 }
 0x12d   :  { %285 = vsyncpa [#allocation7], 1 }
 0x12e   :  { %286 = vsyncpa [#allocation5], 1 }

</bundles_post_ra>
